<compile_context>
chip_gen: v5e
topology: v5e:2x2
jax: 0.10.0
libtpu: 0.0.40
codegen_flags: <defaults>
</compile_context>

<pallas_src>
import jax
import jax.numpy as jnp
from jax.experimental import pallas as pl
from jax.experimental.pallas import tpu as pltpu

HIDDEN = 128  # hidden_layer in the PyTorch module


def _round_up(x, m):
    return ((x + m - 1) // m) * m


def output_gate_kernel(z_ref, h_ref, w_ref, b_ref, o_ref):
    H = o_ref.shape[1]
    cd = w_ref.dtype  # MXU compute dtype (bf16 in production, f32 optional)
    # Cast activations in-kernel (VPU has slack; saves wrapper-side HBM passes).
    z = z_ref[...].astype(cd)
    h = h_ref[...].astype(cd)
    # Two accumulating MXU matmuls against static slices of the stacked weight
    # (zero-cost views); f32 accumulation, bias added in f32 before sigmoid.
    acc = jnp.dot(z, w_ref[0:H, :], preferred_element_type=jnp.float32)
    acc = acc + jnp.dot(h, w_ref[H:2 * H, :], preferred_element_type=jnp.float32)
    o_ref[...] = jax.nn.sigmoid(acc + b_ref[...]).astype(o_ref.dtype)


def prepare_output_gate_params(w1, b1, w2, b2, *, compute_dtype=jnp.bfloat16):
    """Hoisted, do-once parameter prep (call at model init, not per step).

    w1, w2: PyTorch Linear weight layout [out, in]; b1, b2: [H].
    Returns (w_stacked [2H, H] in compute_dtype, b_sum [1, H] f32).
    Row layout of w_stacked is [W1^T ; W2^T], matching the kernel's slices.
    """
    H = w1.shape[0]
    w_stacked = jnp.concatenate([w1.T, w2.T], axis=0).astype(compute_dtype)
    b_sum = (b1 + b2).reshape(1, H).astype(jnp.float32)
    return w_stacked, b_sum


def output_gate(h_tminus1, z_t, w_stacked, b_sum, *, tile_b=512):
    """h_tminus1, z_t: [B, H]. w_stacked/b_sum from prepare_output_gate_params.

    Returns sigmoid(z_t @ W1^T + b1 + h_tminus1 @ W2^T + b2) in z_t.dtype.
    """
    B, H = z_t.shape
    assert h_tminus1.shape == (B, H)
    assert H % 128 == 0, "hidden dim must be lane-aligned (multiple of 128)"
    assert w_stacked.shape == (2 * H, H)

    out_dtype = z_t.dtype

    # Clamp tile to the (sublane-rounded) batch; pad ragged batches only when
    # necessary (pads the original-dtype arrays; no wrapper-side dtype cast).
    tile_b = min(tile_b, _round_up(B, 8))
    Bp = _round_up(B, tile_b)

    z, h = z_t, h_tminus1
    if Bp != B:
        pad = ((0, Bp - B), (0, 0))
        z = jnp.pad(z, pad)
        h = jnp.pad(h, pad)

    grid = (Bp // tile_b,)

    out = pl.pallas_call(
        output_gate_kernel,
        out_shape=jax.ShapeDtypeStruct((Bp, H), out_dtype),
        grid_spec=pltpu.PrefetchScalarGridSpec(
            num_scalar_prefetch=0,
            grid=grid,
            in_specs=[
                pl.BlockSpec((tile_b, H), lambda i: (i, 0)),   # z tile (native dtype)
                pl.BlockSpec((tile_b, H), lambda i: (i, 0)),   # h tile (native dtype)
                pl.BlockSpec((2 * H, H), lambda i: (0, 0)),    # stacked W (resident)
                pl.BlockSpec((1, H), lambda i: (0, 0)),        # pre-summed bias (f32)
            ],
            out_specs=pl.BlockSpec((tile_b, H), lambda i: (i, 0)),
        ),
        compiler_params=pltpu.CompilerParams(
            dimension_semantics=("parallel",)),
    )(z, h, w_stacked, b_sum)

    return out[:B] if Bp != B else out


# TODO(synk): if this gate runs inside a per-timestep LSTM loop, fuse the time
# loop into a single pallas_call (h carried in VMEM scratch, weights resident)
# to remove per-step launch/DMA overhead — requires the surrounding cell code.


if __name__ == "__main__":
    key = jax.random.PRNGKey(0)
    k_h, k_z, k_w1, k_b1, k_w2, k_b2 = jax.random.split(key, 6)

    B, H = 8, HIDDEN

    h_tminus1 = jax.random.normal(k_h, (B, H), dtype=jnp.float32)
    z_t = jax.random.normal(k_z, (B, H), dtype=jnp.float32)

    # Deterministic parameter init (PyTorch Linear default: U(-1/sqrt(H), 1/sqrt(H)))
    bound = 1.0 / (H ** 0.5)
    w1 = jax.random.uniform(k_w1, (H, H), jnp.float32, -bound, bound)
    b1 = jax.random.uniform(k_b1, (H,), jnp.float32, -bound, bound)
    w2 = jax.random.uniform(k_w2, (H, H), jnp.float32, -bound, bound)
    b2 = jax.random.uniform(k_b2, (H,), jnp.float32, -bound, bound)

    # Reference (plain JAX, mirrors the PyTorch forward exactly, f32).
    def ref_fn(h, z):
        return jax.nn.sigmoid(z @ w1.T + b1 + h @ w2.T + b2)

    # --- bf16 MXU path (production default): one-time param prep. ---
    w_bf16, b_sum = prepare_output_gate_params(w1, b1, w2, b2,
                                               compute_dtype=jnp.bfloat16)
    out = jax.block_until_ready(output_gate(h_tminus1, z_t, w_bf16, b_sum))
    assert out.shape == (B, H)
    assert out.dtype == z_t.dtype
    assert jnp.allclose(out, ref_fn(h_tminus1, z_t), atol=2e-2, rtol=2e-2)

    # --- f32 path, ragged batch + multi-step grid (exercises padding). ---
    B2 = 20
    k_h2, k_z2 = jax.random.split(jax.random.PRNGKey(1), 2)
    h2 = jax.random.normal(k_h2, (B2, H), dtype=jnp.float32)
    z2 = jax.random.normal(k_z2, (B2, H), dtype=jnp.float32)
    w_f32, b_sum_f32 = prepare_output_gate_params(w1, b1, w2, b2,
                                                  compute_dtype=jnp.float32)
    out2 = jax.block_until_ready(
        output_gate(h2, z2, w_f32, b_sum_f32, tile_b=8))
    assert out2.shape == (B2, H)
    assert jnp.allclose(out2, ref_fn(h2, z2), atol=1e-5, rtol=1e-5)

    print("KERNEL_OK")
</pallas_src>

<mosaic_0001>
module attributes {stable_mosaic.version = 11 : i64} {
  func.func @output_gate_kernel(%arg0: i32, %arg1: memref<8x128xf32, #tpu.memory_space<vmem>>, %arg2: memref<8x128xf32, #tpu.memory_space<vmem>>, %arg3: memref<256x128xbf16, #tpu.memory_space<vmem>>, %arg4: memref<1x128xf32, #tpu.memory_space<vmem>>, %arg5: memref<8x128xf32, #tpu.memory_space<vmem>>) attributes {dimension_semantics = [#tpu.dimension_semantics<parallel>], iteration_bounds = array<i64: 1>, scalar_prefetch = 0 : i64, scratch_operands = 0 : i64, tpu.core_type = #tpu.core_type<tc>, window_params = [{transform_indices = @transform_0, window_bounds = array<i64: 8, 128>}, {transform_indices = @transform_1, window_bounds = array<i64: 8, 128>}, {pipeline_mode = #tpu.pipeline_mode<synchronous>, transform_indices = @transform_2, window_bounds = array<i64: 256, 128>}, {pipeline_mode = #tpu.pipeline_mode<synchronous>, transform_indices = @transform_3, window_bounds = array<i64: 1, 128>}, {transform_indices = @transform_4, window_bounds = array<i64: 8, 128>}]} {
    %c0 = arith.constant 0 : index
    %c0_0 = arith.constant 0 : index
    %0 = vector.load %arg1[%c0, %c0_0] : memref<8x128xf32, #tpu.memory_space<vmem>>, vector<8x128xf32>
    %1 = arith.truncf %0 : vector<8x128xf32> to vector<8x128xbf16>
    %c0_1 = arith.constant 0 : index
    %c0_2 = arith.constant 0 : index
    %2 = vector.load %arg2[%c0_1, %c0_2] : memref<8x128xf32, #tpu.memory_space<vmem>>, vector<8x128xf32>
    %3 = arith.truncf %2 : vector<8x128xf32> to vector<8x128xbf16>
    %c0_3 = arith.constant 0 : index
    %c0_4 = arith.constant 0 : index
    %4 = vector.load %arg3[%c0_3, %c0_4] : memref<256x128xbf16, #tpu.memory_space<vmem>>, vector<128x128xbf16>
    %cst = arith.constant dense<0.000000e+00> : vector<8x128xf32>
    %5 = tpu.matmul %1, %4, %cst {dimension_numbers = #tpu.dot_dimension_numbers<[1], [0], [0], [1], [0, 0, 1, 1], [], []>} : vector<8x128xbf16>, vector<128x128xbf16>, vector<8x128xf32> -> vector<8x128xf32>
    %c128 = arith.constant 128 : index
    %c0_5 = arith.constant 0 : index
    %6 = vector.load %arg3[%c128, %c0_5] : memref<256x128xbf16, #tpu.memory_space<vmem>>, vector<128x128xbf16>
    %cst_6 = arith.constant dense<0.000000e+00> : vector<8x128xf32>
    %7 = tpu.matmul %3, %6, %cst_6 {dimension_numbers = #tpu.dot_dimension_numbers<[1], [0], [0], [1], [0, 0, 1, 1], [], []>} : vector<8x128xbf16>, vector<128x128xbf16>, vector<8x128xf32> -> vector<8x128xf32>
    %8 = arith.addf %5, %7 : vector<8x128xf32>
    %c0_7 = arith.constant 0 : index
    %c0_8 = arith.constant 0 : index
    %9 = vector.load %arg4[%c0_7, %c0_8] : memref<1x128xf32, #tpu.memory_space<vmem>>, vector<1x128xf32>
    %10 = vector.broadcast %9 : vector<1x128xf32> to vector<8x128xf32>
    %11 = arith.addf %8, %10 : vector<8x128xf32>
    %12 = arith.negf %11 : vector<8x128xf32>
    %13 = math.exp %12 : vector<8x128xf32>
    %cst_9 = arith.constant 1.000000e+00 : f32
    %14 = vector.broadcast %cst_9 : f32 to vector<8x128xf32>
    %15 = arith.addf %14, %13 : vector<8x128xf32>
    %16 = arith.divf %14, %15 : vector<8x128xf32>
    %c0_10 = arith.constant 0 : index
    %c0_11 = arith.constant 0 : index
    %17 = vector.load %arg5[%c0_10, %c0_11] : memref<8x128xf32, #tpu.memory_space<vmem>>, vector<8x128xf32>
    tpu.vector_store %arg5[%c0_10, %c0_11], %16 {strides = array<i32>} : memref<8x128xf32, #tpu.memory_space<vmem>>, vector<8x128xf32>,
    return
  }
  func.func @transform_0(%arg0: i32) -> (i32, i32) {
    %c0_i32 = arith.constant 0 : i32
    %c0_i32_0 = arith.constant 0 : i32
    return %arg0, %c0_i32 : i32, i32
  }
  func.func @transform_1(%arg0: i32) -> (i32, i32) {
    %c0_i32 = arith.constant 0 : i32
    %c0_i32_0 = arith.constant 0 : i32
    return %arg0, %c0_i32 : i32, i32
  }
  func.func @transform_2(%arg0: i32) -> (i32, i32) {
    %c0_i32 = arith.constant 0 : i32
    %c0_i32_0 = arith.constant 0 : i32
    %c0_i32_1 = arith.constant 0 : i32
    return %c0_i32, %c0_i32_0 : i32, i32
  }
  func.func @transform_3(%arg0: i32) -> (i32, i32) {
    %c0_i32 = arith.constant 0 : i32
    %c0_i32_0 = arith.constant 0 : i32
    %c0_i32_1 = arith.constant 0 : i32
    return %c0_i32, %c0_i32_0 : i32, i32
  }
  func.func @transform_4(%arg0: i32) -> (i32, i32) {
    %c0_i32 = arith.constant 0 : i32
    %c0_i32_0 = arith.constant 0 : i32
    return %arg0, %c0_i32 : i32, i32
  }
}

</mosaic_0001>

<bundles_post_ra>
// kernel: tpu_custom_call.1
= control target key start
LH: loop header
LB: loop body
LE: loop exit
PB: predicated region body
PF: predicated region fallthrough
CT: control target
= control target key end

     0   :  { %9 = vsyncpa [#allocation3], 0  ;;  %s502_s0 = inlined_call_operand.hbm [shape: f32[8,128], index: 0, kind: input, shape index: {}]   ;;  %s503_s1 = inlined_call_operand.hbm [shape: f32[8,128], index: 1, kind: input, shape index: {}]   ;;  %s504_s2 = inlined_call_operand.hbm [shape: bf16[256,128], index: 2, kind: input, shape index: {}]   ;;  %s505_s3 = inlined_call_operand.vmem [shape: f32[1,128], index: 3, kind: input, shape index: {}]   ;;  %s506_s4 = inlined_call_operand.hbm [shape: f32[8,128], index: 4, kind: output, shape index: {}]  }
   0x1   :  { %10 = vsyncpa [#allocation6], 0  ;;  %s28_s17 = sshll.u32 %s503_s1, 4  ;;  %s29_s17 = int_to_ptr.hbm [resolvable:$true] %s28_s17 }
   0x2   :  { %11 = vsyncpa [#allocation4], 0  ;;  %s456_s18 = smov [#allocation5]   ;;  %s17_s22 = sshll.u32 %s502_s0, 4  ;;  %s18_s22 = int_to_ptr.hbm [resolvable:$true] %s17_s22 }
   0x3   :  { %s30_s19 = sshll.u32 %s456_s18, 4  ;;  %s457_s23 = smov [#allocation2]   ;;  %s31_s19 = int_to_ptr.vmem [resolvable:$true] %s30_s19 }
   0x4   :  { %33 = dma.hbm_to_vmem [thread:$0]  %s29_s17, 128, %s31_s19, [#allocation6]  }
   0x5   :  { %s19_s24 = sshll.u32 %s457_s23, 4  ;;  %s38_s27 = sshll.u32 %s504_s2, 4  ;;  %s20_s24 = int_to_ptr.vmem [resolvable:$true] %s19_s24  ;;  %s39_s27 = int_to_ptr.hbm [resolvable:$true] %s38_s27 }
   0x6   :  { %22 = dma.hbm_to_vmem [thread:$0]  %s18_s22, 128, %s20_s24, [#allocation3]  }
   0x7   :  { %s458_s1 = smov [#allocation7]   ;;  %s459_s29 = smov 64  }
   0x8   :  { %s40_s28 = sshll.u32 %s458_s1, 4  ;;  %s460_s30 = smov 4   ;;  %s41_s28 = int_to_ptr.vmem [resolvable:$true] %s40_s28 }
   0x9   :  { %46 = dma.hbm_to_vmem [thread:$0]  %s39_s27, 2048, %s41_s28, [#allocation6], %s459_s29, %s459_s29, %s460_s30  }
   0xa   :  { %450 = dma.done.wait [#allocation3], 128  }
   0xb   :  { %451 = vsyncadd [#allocation3], 4294967168 }
   0xc   :  { %452 = dma.done.wait [#allocation6], 2176  }
   0xd   :  { %453 = vsyncadd [#allocation6], 4294965120  ;;  %v342_v0 = vld [vmem:[#allocation7 + $0x78] sm:$0xff]  ;;  %v341_v2 = vld [vmem:[#allocation7 + $0x70] sm:$0xff]  ;;  %s461_s5 = smov [#allocation8]   ;;  %s251_s8 = sshll.u32 %s506_s4, 4  ;;  %s252_s8 = int_to_ptr.hbm [resolvable:$true] %s251_s8 }
   0xe   :  { %v334_v1 = vld [vmem:[#allocation7 + $0x38] sm:$0xff]  ;;  %145 = vmatpush.bf16.msra.mxu0 %v342_v0  ;;  %v333_v3 = vld [vmem:[#allocation7 + $0x30] sm:$0xff]  ;;  %v340_v4 = vld [vmem:[#allocation7 + $0x68] sm:$0xff] }
   0xf   :  { %206 = vmatpush.bf16.msra.mxu1 %v334_v1  ;;  %v332_v5 = vld [vmem:[#allocation7 + $0x28] sm:$0xff]  ;;  %v339_v6 = vld [vmem:[#allocation7 + $0x60] sm:$0xff]  ;;  %v338_v8 = vld [vmem:[#allocation7 + $0x58] sm:$0xff] }
  0x10   :  { %v331_v7 = vld [vmem:[#allocation7 + $0x20] sm:$0xff]  ;;  %v330_v9 = vld [vmem:[#allocation7 + $0x18] sm:$0xff]  ;;  %v337_v10 = vld [vmem:[#allocation7 + $0x50] sm:$0xff] }
  0x11   :  { %v329_v11 = vld [vmem:[#allocation7 + $0x10] sm:$0xff]  ;;  %v336_v12 = vld [vmem:[#allocation7 + $0x48] sm:$0xff]  ;;  %v335_v14 = vld [vmem:[#allocation7 + $0x40] sm:$0xff] }
  0x12   :  { %146 = vmatpush.bf16.msra.mxu0 %v341_v2  ;;  %v328_v13 = vld [vmem:[#allocation7 + $0x8] sm:$0xff]  ;;  %v327_v15 = vld [vmem:[#allocation7] sm:$0xff]  ;;  %v63_v16 = vld [vmem:[#allocation5] sm:$0xff] }
  0x13   :  { %207 = vmatpush.bf16.msra.mxu1 %v333_v3  ;;  %v61_v17 = vld [vmem:[#allocation2] sm:$0xff]  ;;  %v64_v18 = vpack.c.bf16 %v63_v16, %v63_v16 }
  0x14   :  { %v62_v19 = vpack.c.bf16 %v61_v17, %v61_v17  ;;  %v349_v20 = vld [vmem:[%s505_s3] ss:$0 sm:$0xff]  ;;  %s249_s3 = sshll.u32 %s461_s5, 4  ;;  %s250_s3 = int_to_ptr.vmem [resolvable:$true] %s249_s3 }
  0x16   :  { %147 = vmatpush.bf16.msra.mxu0 %v340_v4 }
  0x17   :  { %208 = vmatpush.bf16.msra.mxu1 %v332_v5 }
  0x1a   :  { %148 = vmatpush.bf16.msra.mxu0 %v339_v6 }
  0x1b   :  { %209 = vmatpush.bf16.msra.mxu1 %v331_v7 }
  0x1e   :  { %149 = vmatpush.bf16.msra.mxu0 %v338_v8 }
  0x1f   :  { %210 = vmatpush.bf16.msra.mxu1 %v330_v9 }
  0x22   :  { %150 = vmatpush.bf16.msra.mxu0 %v337_v10 }
  0x23   :  { %211 = vmatpush.bf16.msra.mxu1 %v329_v11 }
  0x26   :  { %151 = vmatpush.bf16.msra.mxu0 %v336_v12 }
  0x27   :  { %212 = vmatpush.bf16.msra.mxu1 %v328_v13 }
  0x2a   :  { %152 = vmatpush.bf16.msra.mxu0 %v335_v14 }
  0x2b   :  { %213 = vmatpush.bf16.msra.mxu1 %v327_v15 }
  0x2d   :  { %153 = vmatmul.bf16.vlgmr.msra.gmra.mxu0 %v64_v18 }
  0x2e   :  { %214 = vmatmul.bf16.vlgmr.msra.gmra.mxu1 %v62_v19 }
  0xaa   :  { %v154_v21 = vpop.f32.mrf.mxu0 }
  0xab   :  { %v215_v22 = vpop.f32.mrf.mxu1 }
  0xac   :  { %v216_v23 = vadd.f32 %v215_v22, %v154_v21 }
  0xae   :  { %v223_v24 = vadd.f32 %v349_v20, %v216_v23 }
  0xb0   :  { %v326_v25 = vmul.f32 -1.442695, %v223_v24 }
  0xb2   :  { %350 = vpow2.f32 %v326_v25  ;;  %v156_v26 = vpop.f32.mrf.mxu0 }
  0xb3   :  { %v217_v27 = vpop.f32.mrf.mxu1 }
  0xb8   :  { %v351_v28 = vpop.eup %350 }
  0xb9   :  { %v227_v29 = vadd.f32 1.0, %v351_v28 }
  0xbb   :  { %352 = vrcp.f32 %v227_v29  ;;  %v239_v33 = vand.u32 2147483648, %v227_v29  ;;  %v237_v35 = vand.u32 2147483647, %v227_v29  ;;  %vm233_vm1 = vweird.f32 %v227_v29 }
  0xbd   :  { %v240_v37 = vor.u32 1.1754944e-38, %v239_v33  ;;  %vm238_vm3 = vcmp.eq.f32.partialorder %v237_v35, 8.507059e+37 }
  0xc1   :  { %v353_v30 = vpop.eup %352 }
  0xc2   :  { %v229_v31 = vmul.f32 %v353_v30, %v227_v29  ;;  %vm234_vm0 = vweird.f32 %v353_v30 }
  0xc3   :  { %vm235_vm2 = vmor %vm233_vm1, %vm234_vm0 }
  0xc4   :  { %v230_v32 = vsub.f32 1.0, %v229_v31 }
  0xc6   :  { %v231_v34 = vmul.f32 %v353_v30, %v230_v32 }
  0xc8   :  { %v232_v36 = vadd.f32 %v353_v30, %v231_v34 }
  0xca   :  { %v236_v38 = vsel %vm235_vm2, %v353_v30, %v232_v36 }
  0xcb   :  { %v241_v39 = vsel %vm238_vm3, %v240_v37, %v236_v38 }
  0xcc   :  { %243 = vst [vmem:[#allocation8] sm:$0xff] %v241_v39 }
  0xcd   :  { %254 = dma.vmem_to_hbm [thread:$0]  %s250_s3, 128, %s252_s8, [#allocation4]  }
  0xce   :  { %454 = dma.done.wait [#allocation4], 128  }
  0xcf   :  { %455 = vsyncadd [#allocation4], 4294967168 }
  0xd0   :  { %259 = vsyncpa [#allocation3], 1 }
  0xd1   :  { %260 = vsyncpa [#allocation6], 1 }
  0xd2   :  { %261 = vsyncpa [#allocation4], 1 }

</bundles_post_ra>
